<compile_context>
chip_gen: v6e
topology: v6e:2x2x1
jax: 0.10.0
libtpu: 0.0.40
codegen_flags: <defaults>
</compile_context>

<pallas_src>
import functools

import jax
import jax.numpy as jnp
from jax.experimental import pallas as pl
from jax.experimental.pallas import tpu as pltpu


def _cl_loss_kernel(q_ref, k_ref, p_ref, out_ref, kn_ref, u_ref, v_ref, pos_ref,
                    *, temperature):
    # q_ref: (TM, H) query row tile, k_ref: (N, H) all keys,
    # p_ref: (TM, 1) int32 positive-key row index for this tile,
    # out_ref: (1,) f32 in SMEM,
    # kn_ref: (N, H) f32 normalized keys (VMEM scratch, filled at step 0),
    # u_ref/v_ref: (1, N) f32 column-sum accumulators, pos_ref: (1,) f32 SMEM.
    step = pl.program_id(0)
    n = k_ref.shape[0]
    tm = q_ref.shape[0]
    eps2 = 1e-24  # matches F.normalize's max(norm, 1e-12) clamp

    @pl.when(step == 0)
    def _init():
        k = k_ref[...].astype(jnp.float32)
        k_inv = jax.lax.rsqrt(jnp.maximum(jnp.sum(k * k, axis=-1, keepdims=True), eps2))
        kn_ref[...] = k * k_inv
        u_ref[...] = jnp.zeros_like(u_ref)
        v_ref[...] = jnp.zeros_like(v_ref)
        pos_ref[0] = 0.0

    # Normalize this query tile (rsqrt -> EUP) and hit the MXU once.
    q = q_ref[...].astype(jnp.float32)
    q_inv = jax.lax.rsqrt(jnp.maximum(jnp.sum(q * q, axis=-1, keepdims=True), eps2))
    qn = q * q_inv                                                     # (TM, H)
    s = jnp.einsum("ih,jh->ij", qn, kn_ref[...],
                   preferred_element_type=jnp.float32)                 # (TM, N)

    # PyTorch key ordering gives logits:
    #   output[i, 0]       = s[i, p_i]
    #   output[i, c], c>=1 = s[i, c-1] if c-1 < p_i else s[i, c]
    # Batch-sum per output column c:
    #   N*m[0] = sum_i s[i, p_i]
    #   N*m[c] = U[c-1] + V[c],  U[j] = sum_i [j < p_i] s[i, j]
    #                            V[j] = sum_i [j > p_i] s[i, j]
    p = p_ref[...]                                                     # (TM, 1)
    col = jax.lax.broadcasted_iota(jnp.int32, (tm, n), 1)
    pos_ref[0] = pos_ref[0] + jnp.sum(jnp.where(col == p, s, 0.0))
    u_ref[...] = u_ref[...] + jnp.sum(jnp.where(col < p, s, 0.0), axis=0, keepdims=True)
    v_ref[...] = v_ref[...] + jnp.sum(jnp.where(col > p, s, 0.0), axis=0, keepdims=True)

    @pl.when(step == pl.num_programs(0) - 1)
    def _finalize():
        inv_nt = 1.0 / (float(n) * temperature)   # fold 1/N and 1/T together
        pos_sum = pos_ref[0]
        u = u_ref[...]                                                 # (1, N)
        v = v_ref[...]                                                 # (1, N)

        # Shift u right by one column (u_shift[c] = u[c-1], u_shift[0] = don't
        # care, overwritten) using a constant shift matrix on the otherwise
        # idle MXU — no lane roll needed.
        row2 = jax.lax.broadcasted_iota(jnp.int32, (n, n), 0)
        col2 = jax.lax.broadcasted_iota(jnp.int32, (n, n), 1)
        shift_m = (col2 == row2 + 1).astype(jnp.float32)               # (N, N)
        u_shift = jnp.dot(u, shift_m, preferred_element_type=jnp.float32)

        col_v = jax.lax.broadcasted_iota(jnp.int32, (1, n), 1)
        m = jnp.where(col_v == 0, pos_sum, u_shift + v) * inv_nt       # (1, N)
        m_pos = pos_sum * inv_nt

        # loss = -log( exp(m_pos) / sum_c exp(m[c]) ) = logsumexp(m) - m_pos
        mx = jnp.max(m)
        lse = mx + jnp.log(jnp.sum(jnp.exp(m - mx)))
        out_ref[0] = lse - m_pos


def _pick_row_tile(n, row_tile):
    if row_tile is not None:
        assert n % row_tile == 0
        return row_tile
    if n <= 1024:
        return n                       # single block: whole problem fits VMEM
    for tm in (1024, 512, 256, 128, 8):
        if n % tm == 0:
            return tm
    return n


def contrastive_loss_pallas(utter_emb1, utter_emb2, positive_index,
                            temperature=0.1, row_tile=None):
    """Fused get_all_keys_embedding + contrastive_loss_batch (Pallas TPU)."""
    N, H = utter_emb1.shape
    assert utter_emb2.shape == (N, H)
    tm = _pick_row_tile(N, row_tile)
    p = positive_index.astype(jnp.int32).reshape(N, 1)

    out = pl.pallas_call(
        functools.partial(_cl_loss_kernel, temperature=temperature),
        out_shape=jax.ShapeDtypeStruct((1,), jnp.float32),
        grid=(N // tm,),
        in_specs=[
            pl.BlockSpec((tm, H), lambda i: (i, 0)),     # query row tile
            pl.BlockSpec((N, H), lambda i: (0, 0)),      # all keys (fetched once)
            pl.BlockSpec((tm, 1), lambda i: (i, 0)),     # positive index per row
        ],
        out_specs=pl.BlockSpec(memory_space=pltpu.MemorySpace.SMEM),
        scratch_shapes=[
            pltpu.VMEM((N, H), jnp.float32),   # normalized keys
            pltpu.VMEM((1, N), jnp.float32),   # U accumulator
            pltpu.VMEM((1, N), jnp.float32),   # V accumulator
            pltpu.SMEM((1,), jnp.float32),     # positive-diagonal accumulator
        ],
        compiler_params=pltpu.CompilerParams(
            dimension_semantics=("arbitrary",)),
    )(utter_emb1, utter_emb2, p)
    return out[0]


def sample_positive_index(labels, key):
    """For each i, uniformly pick an index j with labels[j] == labels[i]."""
    n = labels.shape[0]
    same = labels[:, None] == labels[None, :]
    g = jax.random.uniform(key, (n, n))
    # argmax of iid uniforms restricted to the same-label set is a uniform draw
    # from that set (the set always contains i itself, so it is never empty).
    return jnp.argmax(jnp.where(same, g, -1.0), axis=1).astype(jnp.int32)


def contrastive_learning_forward(utter_emb1, utter_emb2, labels, key, temperature=0.1):
    """JAX/Pallas equivalent of ContrastiveLearning.forward."""
    # TODO(synk): the per-sample torch.randint positive sampling is a
    # data-dependent Python loop in PyTorch; it is reproduced with jax.random
    # here (outside the kernel) rather than inside Pallas.
    positive_index = sample_positive_index(labels, key)
    return contrastive_loss_pallas(utter_emb1, utter_emb2, positive_index, temperature)


def _reference_forward(utter_emb1, utter_emb2, positive_index, temperature=0.1):
    """Pure-JAX port of the PyTorch math (explicit key gather) for validation."""
    n = utter_emb1.shape[0]
    p = positive_index.astype(jnp.int32)[:, None]                    # (N, 1)
    c = jnp.arange(n - 1)[None, :]
    neg = jnp.where(c < p, c, c + 1)                                  # (N, N-1)
    label_keys = jnp.concatenate([p, neg], axis=1)                    # (N, N)
    keys = utter_emb2[label_keys]                                     # (N, N, H)

    eps = 1e-12
    qn = utter_emb1 / jnp.maximum(
        jnp.linalg.norm(utter_emb1, axis=-1, keepdims=True), eps)
    kn = keys / jnp.maximum(jnp.linalg.norm(keys, axis=-1, keepdims=True), eps)
    output = jnp.einsum("nh,nch->nc", qn, kn)                         # (N, N)
    numerator = jnp.exp(jnp.mean(output[:, 0]) / temperature)
    denominator = jnp.sum(jnp.exp(jnp.mean(output, axis=0) / temperature))
    return -jnp.log(numerator / denominator)


if __name__ == "__main__":
    # Small shapes consistent with the module: N=8 utterances, H=32 hidden,
    # 3 classes.  Keys per query = N (1 positive + N-1 negatives).
    N, H, num_classes = 8, 32, 3
    key = jax.random.PRNGKey(0)
    k_e1, k_e2, k_lab, k_pos = jax.random.split(key, 4)
    utter_emb1 = jax.random.normal(k_e1, (N, H), dtype=jnp.float32)
    utter_emb2 = jax.random.normal(k_e2, (N, H), dtype=jnp.float32)
    labels = jax.random.randint(k_lab, (N,), 0, num_classes)

    # Random same-label positive selection (done in plain JAX, see module notes).
    positive_index = sample_positive_index(labels, k_pos)

    loss = jax.block_until_ready(
        contrastive_loss_pallas(utter_emb1, utter_emb2, positive_index))
    ref = _reference_forward(utter_emb1, utter_emb2, positive_index)
    assert jnp.allclose(loss, ref, atol=1e-5, rtol=1e-5), (loss, ref)

    # Exercise the full forward path (labels -> random positives -> loss).
    full = jax.block_until_ready(
        contrastive_learning_forward(utter_emb1, utter_emb2, labels, k_pos))

    # Also validate the row-tiled (multi-grid-step accumulation) path.
    N2, H2 = 256, 128
    k2 = jax.random.PRNGKey(1)
    k_a, k_b, k_l, k_p = jax.random.split(k2, 4)
    e1 = jax.random.normal(k_a, (N2, H2), dtype=jnp.float32)
    e2 = jax.random.normal(k_b, (N2, H2), dtype=jnp.float32)
    lab2 = jax.random.randint(k_l, (N2,), 0, 8)
    pos2 = sample_positive_index(lab2, k_p)
    loss2 = jax.block_until_ready(
        contrastive_loss_pallas(e1, e2, pos2, row_tile=128))
    ref2 = _reference_forward(e1, e2, pos2)
    assert jnp.allclose(loss2, ref2, atol=1e-4, rtol=1e-4), (loss2, ref2)

    print("KERNEL_OK")
</pallas_src>

<mosaic_0001>
module attributes {stable_mosaic.version = 11 : i64} {
  func.func @_cl_loss_kernel(%arg0: i32, %arg1: memref<8x32xf32, #tpu.memory_space<vmem>>, %arg2: memref<8x32xf32, #tpu.memory_space<vmem>>, %arg3: memref<8x1xi32, #tpu.memory_space<vmem>>, %arg4: memref<1xf32, #tpu.memory_space<smem>>, %arg5: memref<8x32xf32, #tpu.memory_space<vmem>>, %arg6: memref<1x8xf32, #tpu.memory_space<vmem>>, %arg7: memref<1x8xf32, #tpu.memory_space<vmem>>, %arg8: memref<1xf32, #tpu.memory_space<smem>>) attributes {dimension_semantics = [#tpu.dimension_semantics<arbitrary>], iteration_bounds = array<i64: 1>, scalar_prefetch = 0 : i64, scratch_operands = 4 : i64, tpu.core_type = #tpu.core_type<tc>, window_params = [{transform_indices = @transform_0, window_bounds = array<i64: 8, 32>}, {pipeline_mode = #tpu.pipeline_mode<synchronous>, transform_indices = @transform_1, window_bounds = array<i64: 8, 32>}, {transform_indices = @transform_2, window_bounds = array<i64: 8, 1>}, {transform_indices = @transform_3, window_bounds = array<i64: 1>}]} {
    %c0_i32 = arith.constant 0 : i32
    %0 = arith.cmpi eq, %arg0, %c0_i32 : i32
    %1 = arith.extui %0 : i1 to i32
    %c0_i32_0 = arith.constant 0 : i32
    %2 = arith.cmpi ne, %1, %c0_i32_0 : i32
    scf.if %2 {
      %c0_26 = arith.constant 0 : index
      %c0_27 = arith.constant 0 : index
      %48 = vector.load %arg2[%c0_26, %c0_27] : memref<8x32xf32, #tpu.memory_space<vmem>>, vector<8x32xf32>
      %49 = arith.mulf %48, %48 : vector<8x32xf32>
      %cst_28 = arith.constant dense<0.000000e+00> : vector<8xf32>
      %50 = vector.multi_reduction <add>, %49, %cst_28 [1] : vector<8x32xf32> to vector<8xf32>
      %51 = vector.shape_cast %50 : vector<8xf32> to vector<8x1xf32>
      %cst_29 = arith.constant 1.000000e-24 : f32
      %52 = vector.broadcast %cst_29 : f32 to vector<8x1xf32>
      %53 = arith.maximumf %51, %52 : vector<8x1xf32>
      %54 = math.rsqrt %53 : vector<8x1xf32>
      %55 = vector.broadcast %54 : vector<8x1xf32> to vector<8x32xf32>
      %56 = arith.mulf %48, %55 : vector<8x32xf32>
      %c0_30 = arith.constant 0 : index
      %c0_31 = arith.constant 0 : index
      %57 = vector.load %arg5[%c0_30, %c0_31] : memref<8x32xf32, #tpu.memory_space<vmem>>, vector<8x32xf32>
      tpu.vector_store %arg5[%c0_30, %c0_31], %56 {strides = array<i32>} : memref<8x32xf32, #tpu.memory_space<vmem>>, vector<8x32xf32>,
      %cst_32 = arith.constant 0.000000e+00 : f32
      %58 = vector.broadcast %cst_32 : f32 to vector<1x8xf32>
      %c0_33 = arith.constant 0 : index
      %c0_34 = arith.constant 0 : index
      %59 = vector.load %arg6[%c0_33, %c0_34] : memref<1x8xf32, #tpu.memory_space<vmem>>, vector<1x8xf32>
      tpu.vector_store %arg6[%c0_33, %c0_34], %58 {strides = array<i32>} : memref<1x8xf32, #tpu.memory_space<vmem>>, vector<1x8xf32>,
      %cst_35 = arith.constant 0.000000e+00 : f32
      %60 = vector.broadcast %cst_35 : f32 to vector<1x8xf32>
      %c0_36 = arith.constant 0 : index
      %c0_37 = arith.constant 0 : index
      %61 = vector.load %arg7[%c0_36, %c0_37] : memref<1x8xf32, #tpu.memory_space<vmem>>, vector<1x8xf32>
      tpu.vector_store %arg7[%c0_36, %c0_37], %60 {strides = array<i32>} : memref<1x8xf32, #tpu.memory_space<vmem>>, vector<1x8xf32>,
      %cst_38 = arith.constant 0.000000e+00 : f32
      %c0_39 = arith.constant 0 : index
      %62 = memref.load %arg8[%c0_39] : memref<1xf32, #tpu.memory_space<smem>>
      memref.store %cst_38, %arg8[%c0_39] : memref<1xf32, #tpu.memory_space<smem>>
    } else {
    }
    %c0 = arith.constant 0 : index
    %c0_1 = arith.constant 0 : index
    %3 = vector.load %arg1[%c0, %c0_1] : memref<8x32xf32, #tpu.memory_space<vmem>>, vector<8x32xf32>
    %4 = arith.mulf %3, %3 : vector<8x32xf32>
    %cst = arith.constant dense<0.000000e+00> : vector<8xf32>
    %5 = vector.multi_reduction <add>, %4, %cst [1] : vector<8x32xf32> to vector<8xf32>
    %6 = vector.shape_cast %5 : vector<8xf32> to vector<8x1xf32>
    %cst_2 = arith.constant 1.000000e-24 : f32
    %7 = vector.broadcast %cst_2 : f32 to vector<8x1xf32>
    %8 = arith.maximumf %6, %7 : vector<8x1xf32>
    %9 = math.rsqrt %8 : vector<8x1xf32>
    %10 = vector.broadcast %9 : vector<8x1xf32> to vector<8x32xf32>
    %11 = arith.mulf %3, %10 : vector<8x32xf32>
    %c0_3 = arith.constant 0 : index
    %c0_4 = arith.constant 0 : index
    %12 = vector.load %arg5[%c0_3, %c0_4] : memref<8x32xf32, #tpu.memory_space<vmem>>, vector<8x32xf32>
    "tpu.trace_start"() <{level = 10 : i32, message = "ih,jh->ij"}> : () -> ()
    %cst_5 = arith.constant dense<0.000000e+00> : vector<8x8xf32>
    %13 = tpu.matmul %11, %12, %cst_5 {dimension_numbers = #tpu.dot_dimension_numbers<[1], [1], [0], [0], [0, 0, 1, 0], [], []>} : vector<8x32xf32>, vector<8x32xf32>, vector<8x8xf32> -> vector<8x8xf32>
    "tpu.trace_stop"() : () -> ()
    %c0_6 = arith.constant 0 : index
    %c0_7 = arith.constant 0 : index
    %14 = vector.load %arg3[%c0_6, %c0_7] : memref<8x1xi32, #tpu.memory_space<vmem>>, vector<8x1xi32>
    %15 = tpu.iota {dimensions = array<i32: 1>} : vector<8x8xi32>
    %c0_8 = arith.constant 0 : index
    %16 = memref.load %arg8[%c0_8] : memref<1xf32, #tpu.memory_space<smem>>
    %17 = vector.broadcast %14 : vector<8x1xi32> to vector<8x8xi32>
    %18 = arith.cmpi eq, %15, %17 : vector<8x8xi32>
    %cst_9 = arith.constant 0.000000e+00 : f32
    %19 = vector.broadcast %cst_9 : f32 to vector<8x8xf32>
    %20 = arith.select %18, %13, %19 : vector<8x8xi1>, vector<8x8xf32>
    %21 = vector.shape_cast %20 : vector<8x8xf32> to vector<1x8x8xf32>
    %cst_10 = arith.constant dense<0.000000e+00> : vector<1xf32>
    %22 = vector.multi_reduction <add>, %21, %cst_10 [1, 2] : vector<1x8x8xf32> to vector<1xf32>
    %23 = vector.shape_cast %22 : vector<1xf32> to vector<1x1x1xf32>
    %24 = vector.extract %23[0, 0, 0] : f32 from vector<1x1x1xf32>
    %25 = arith.addf %16, %24 : f32
    %c0_11 = arith.constant 0 : index
    %26 = memref.load %arg8[%c0_11] : memref<1xf32, #tpu.memory_space<smem>>
    memref.store %25, %arg8[%c0_11] : memref<1xf32, #tpu.memory_space<smem>>
    %c0_12 = arith.constant 0 : index
    %c0_13 = arith.constant 0 : index
    %27 = vector.load %arg6[%c0_12, %c0_13] : memref<1x8xf32, #tpu.memory_space<vmem>>, vector<1x8xf32>
    %28 = vector.broadcast %14 : vector<8x1xi32> to vector<8x8xi32>
    %29 = arith.cmpi slt, %15, %28 : vector<8x8xi32>
    %cst_14 = arith.constant 0.000000e+00 : f32
    %30 = vector.broadcast %cst_14 : f32 to vector<8x8xf32>
    %31 = arith.select %29, %13, %30 : vector<8x8xi1>, vector<8x8xf32>
    %cst_15 = arith.constant dense<0.000000e+00> : vector<8xf32>
    %32 = vector.multi_reduction <add>, %31, %cst_15 [0] : vector<8x8xf32> to vector<8xf32>
    %33 = vector.shape_cast %32 : vector<8xf32> to vector<1x8xf32>
    %34 = arith.addf %27, %33 : vector<1x8xf32>
    %c0_16 = arith.constant 0 : index
    %c0_17 = arith.constant 0 : index
    %35 = vector.load %arg6[%c0_16, %c0_17] : memref<1x8xf32, #tpu.memory_space<vmem>>, vector<1x8xf32>
    tpu.vector_store %arg6[%c0_16, %c0_17], %34 {strides = array<i32>} : memref<1x8xf32, #tpu.memory_space<vmem>>, vector<1x8xf32>,
    %c0_18 = arith.constant 0 : index
    %c0_19 = arith.constant 0 : index
    %36 = vector.load %arg7[%c0_18, %c0_19] : memref<1x8xf32, #tpu.memory_space<vmem>>, vector<1x8xf32>
    %37 = vector.broadcast %14 : vector<8x1xi32> to vector<8x8xi32>
    %38 = arith.cmpi sgt, %15, %37 : vector<8x8xi32>
    %cst_20 = arith.constant 0.000000e+00 : f32
    %39 = vector.broadcast %cst_20 : f32 to vector<8x8xf32>
    %40 = arith.select %38, %13, %39 : vector<8x8xi1>, vector<8x8xf32>
    %cst_21 = arith.constant dense<0.000000e+00> : vector<8xf32>
    %41 = vector.multi_reduction <add>, %40, %cst_21 [0] : vector<8x8xf32> to vector<8xf32>
    %42 = vector.shape_cast %41 : vector<8xf32> to vector<1x8xf32>
    %43 = arith.addf %36, %42 : vector<1x8xf32>
    %c0_22 = arith.constant 0 : index
    %c0_23 = arith.constant 0 : index
    %44 = vector.load %arg7[%c0_22, %c0_23] : memref<1x8xf32, #tpu.memory_space<vmem>>, vector<1x8xf32>
    tpu.vector_store %arg7[%c0_22, %c0_23], %43 {strides = array<i32>} : memref<1x8xf32, #tpu.memory_space<vmem>>, vector<1x8xf32>,
    %c0_i32_24 = arith.constant 0 : i32
    %45 = arith.cmpi eq, %arg0, %c0_i32_24 : i32
    %46 = arith.extui %45 : i1 to i32
    %c0_i32_25 = arith.constant 0 : i32
    %47 = arith.cmpi ne, %46, %c0_i32_25 : i32
    scf.if %47 {
      %c0_26 = arith.constant 0 : index
      %48 = memref.load %arg8[%c0_26] : memref<1xf32, #tpu.memory_space<smem>>
      %c0_27 = arith.constant 0 : index
      %c0_28 = arith.constant 0 : index
      %49 = vector.load %arg6[%c0_27, %c0_28] : memref<1x8xf32, #tpu.memory_space<vmem>>, vector<1x8xf32>
      %c0_29 = arith.constant 0 : index
      %c0_30 = arith.constant 0 : index
      %50 = vector.load %arg7[%c0_29, %c0_30] : memref<1x8xf32, #tpu.memory_space<vmem>>, vector<1x8xf32>
      %51 = tpu.iota {dimensions = array<i32: 0>} : vector<8x8xi32>
      %52 = tpu.iota {dimensions = array<i32: 1>} : vector<8x8xi32>
      %c1_i32 = arith.constant 1 : i32
      %53 = vector.broadcast %c1_i32 : i32 to vector<8x8xi32>
      %54 = arith.addi %51, %53 : vector<8x8xi32>
      %55 = arith.cmpi eq, %52, %54 : vector<8x8xi32>
      %56 = arith.extui %55 : vector<8x8xi1> to vector<8x8xi32>
      %57 = arith.sitofp %56 : vector<8x8xi32> to vector<8x8xf32>
      %cst_31 = arith.constant dense<0.000000e+00> : vector<1x8xf32>
      %58 = tpu.matmul %49, %57, %cst_31 {dimension_numbers = #tpu.dot_dimension_numbers<[1], [0], [0], [1], [0, 0, 1, 1], [], []>} : vector<1x8xf32>, vector<8x8xf32>, vector<1x8xf32> -> vector<1x8xf32>
      %59 = tpu.iota {dimensions = array<i32: 1>} : vector<1x8xi32>
      %c0_i32_32 = arith.constant 0 : i32
      %60 = vector.broadcast %c0_i32_32 : i32 to vector<1x8xi32>
      %61 = arith.cmpi eq, %59, %60 : vector<1x8xi32>
      %62 = arith.addf %58, %50 : vector<1x8xf32>
      %63 = vector.broadcast %48 : f32 to vector<1x8xf32>
      %64 = arith.select %61, %63, %62 : vector<1x8xi1>, vector<1x8xf32>
      %cst_33 = arith.constant 1.250000e+00 : f32
      %65 = vector.broadcast %cst_33 : f32 to vector<1x8xf32>
      %66 = arith.mulf %64, %65 : vector<1x8xf32>
      %cst_34 = arith.constant 1.250000e+00 : f32
      %67 = arith.mulf %48, %cst_34 : f32
      %68 = vector.shape_cast %66 : vector<1x8xf32> to vector<1x1x8xf32>
      %cst_35 = arith.constant dense<0xFF800000> : vector<1xf32>
      %69 = vector.multi_reduction <maximumf>, %68, %cst_35 [1, 2] : vector<1x1x8xf32> to vector<1xf32>
      %70 = vector.shape_cast %69 : vector<1xf32> to vector<1x1x1xf32>
      %71 = vector.extract %70[0, 0, 0] : f32 from vector<1x1x1xf32>
      %72 = vector.broadcast %71 : f32 to vector<1x8xf32>
      %73 = arith.subf %66, %72 : vector<1x8xf32>
      %74 = math.exp %73 : vector<1x8xf32>
      %75 = vector.shape_cast %74 : vector<1x8xf32> to vector<1x1x8xf32>
      %cst_36 = arith.constant dense<0.000000e+00> : vector<1xf32>
      %76 = vector.multi_reduction <add>, %75, %cst_36 [1, 2] : vector<1x1x8xf32> to vector<1xf32>
      %77 = vector.shape_cast %76 : vector<1xf32> to vector<1x1x1xf32>
      %78 = vector.extract %77[0, 0, 0] : f32 from vector<1x1x1xf32>
      %79 = math.log %78 : f32
      %80 = arith.addf %71, %79 : f32
      %81 = arith.subf %80, %67 : f32
      %c0_37 = arith.constant 0 : index
      %82 = memref.load %arg4[%c0_37] : memref<1xf32, #tpu.memory_space<smem>>
      memref.store %81, %arg4[%c0_37] : memref<1xf32, #tpu.memory_space<smem>>
    } else {
    }
    return
  }
  func.func @transform_0(%arg0: i32) -> (i32, i32) {
    %c0_i32 = arith.constant 0 : i32
    %c0_i32_0 = arith.constant 0 : i32
    return %arg0, %c0_i32 : i32, i32
  }
  func.func @transform_1(%arg0: i32) -> (i32, i32) {
    %c0_i32 = arith.constant 0 : i32
    %c0_i32_0 = arith.constant 0 : i32
    %c0_i32_1 = arith.constant 0 : i32
    return %c0_i32, %c0_i32_0 : i32, i32
  }
  func.func @transform_2(%arg0: i32) -> (i32, i32) {
    %c0_i32 = arith.constant 0 : i32
    %c0_i32_0 = arith.constant 0 : i32
    return %arg0, %c0_i32 : i32, i32
  }
  func.func @transform_3(%arg0: i32) -> i32 {
    %c0_i32 = arith.constant 0 : i32
    %c0_i32_0 = arith.constant 0 : i32
    return %c0_i32 : i32
  }
}

</mosaic_0001>

<bundles_post_ra>
// kernel: tpu_custom_call.1
= control target key start
LH: loop header
LB: loop body
LE: loop exit
PB: predicated region body
PF: predicated region fallthrough
CT: control target
= control target key end

     0   :  { %8 = vsyncpa [#allocation7], 0  ;;  %s448_s0 = inlined_call_operand.vmem [shape: f32[8,32], index: 0, kind: input, shape index: {}]   ;;  %s449_s1 = inlined_call_operand.hbm [shape: f32[8,32], index: 1, kind: input, shape index: {}]   ;;  %s450_s2 = inlined_call_operand.vmem [shape: s32[8,1], index: 2, kind: input, shape index: {}]   ;;  %s451_s3 = inlined_call_operand.hbm [shape: f32[1], index: 3, kind: output, shape index: {}]  }
   0x1   :  { %9 = vsyncpa [#allocation8], 0  ;;  %s391_s12 = smov [#allocation6]  }
   0x2   :  { %s18_s13 = sshll.u32 %s391_s12, 4  ;;  %s19_s13 = int_to_ptr.vmem [resolvable:$true] %s18_s13 }
   0x3   :  { %s367_s14 = scalar_lea.vmem %s19_s13, 128  ;;  %p372_p1 = scmp.lt.s32.totalorder %s19_s13, %s19_s13 }
   0x4   :  { %p368_p0 = scmp.ne.s32.totalorder %s19_s13, %s367_s14  ;;  %p373_p2 = scmp.lt.s32.totalorder %s367_s14, %s367_s14 }
   0x6   :  { %p374_p3 = por %p373_p2, %p372_p1 }
   0x8   :  { %p375_p4 = pnand %p374_p3, %p368_p0 }
   0xa   :  { %378 = shalt.err (!%p375_p4)
}
   0xb   :  { %21 = dma.hbm_to_vmem [thread:$0]  %s449_s1, 128, %s19_s13, [#allocation7]  }
   0xc   :  { %387 = dma.done.wait [#allocation7], 128  }
   0xd   :  { %388 = vsyncadd [#allocation7], 4294967168  ;;  %v31_v0 = vld [vmem:[#allocation6] sm:$0xff]  ;;  %vm33_vm0 = vcmask 261120   ;;  %v46_v1 = vld [vmem:[%s448_s0] sm:$0xff]  ;;  %vm41_vm1 = vcmask 57344   ;;  %v133_v18 = vlaneseq }
   0xe   :  { %v32_v2 = vmul.f32 %v31_v0, %v31_v0  ;;  %v47_v3 = vmul.f32 %v46_v1, %v46_v1  ;;  %v392_v6 = vmov 0.0   ;;  %vm393_vm2 = vmmov 0   ;;  %v132_v7 = vld [vmem:[%s450_s2] sm:$0xff]  ;;  %s396_s25 = smov [#allocation9]  }
   0xf   :  { %42 = vst.msk [vmem:[#allocation3] sm:$0x1] %vm41_vm1, %v392_v6  ;;  %43 = vst.msk [vmem:[#allocation4] sm:$0x1] %vm41_vm1, %v392_v6  ;;  %325 = vmatprep.subr.mxu0 %v392_v6  ;;  %330 = vmatprep.subr.mxu1 %v392_v6  ;;  %v394_v8 = vmov 0   ;;  %v187_v19 = vshrl.u32 %v133_v18, 7 }
  0x10   :  { %v34_v4 = vsel %vm33_vm0, %v32_v2, 0.0  ;;  %v49_v5 = vsel %vm33_vm0, %v47_v3, 0.0  ;;  %327 = vmatprep.mubr.msk.f32.mxu0 %vm393_vm2, %v392_v6  ;;  %332 = vmatprep.mubr.msk.f32.mxu1 %vm393_vm2, %v392_v6  ;;  %v134_v20 = vand.u32 127, %v133_v18  ;;  %v395_v22 = vmov 1.0  }
  0x11   :  { %35 = vadd.xlane.f32.xlu0 %v34_v4  ;;  %349 = vset.pattern.permute.xlu1 %v394_v8  ;;  %v188_v21 = vadd.s32 1, %v187_v19  ;;  %vm141_vm7 = vcmask 64512  }
  0x12   :  { %350 = vset.pattern.permute.xlu0 %v394_v8  ;;  %137 = vperm.xlu1 %349, %v132_v7   ;;  %vm192_vm8 = vcmp.eq.s32.totalorder %v134_v20, 0 }
  0x13   :  { %vm189_vm3 = vcmp.eq.s32.totalorder %v134_v20, %v188_v21 }
  0x14   :  { %331 = vmatpush3.msk.msra.mxu1 %vm189_vm3, %v395_v22 }
  0x15   :  { %50 = vadd.xlane.f32.xlu0 %v49_v5 }
  0x16   :  { %v155_v42 = vld [vmem:[#allocation3] sm:$0x1]  ;;  %v168_v43 = vld [vmem:[#allocation4] sm:$0x1] }
  0x8d   :  { %v138_v23 = vpop.permute.xlu1 %137 }
  0x8e   :  { %vm156_vm4 = vcmp.lt.s32.totalorder %v134_v20, %v138_v23  ;;  %vm169_vm5 = vcmp.gt.s32.totalorder %v134_v20, %v138_v23  ;;  %vm139_vm6 = vcmp.eq.s32.totalorder %v134_v20, %v138_v23 }
  0x9a   :  { %v36_v9 = vpop.xlane.xlu0 %35 }
  0x9b   :  { %v37_v10 = vmax.f32 %v36_v9, 1e-24 }
  0x9d   :  { %351 = vrsqrt.f32 %v37_v10 }
  0x9e   :  { %v51_v11 = vpop.xlane.xlu0 %50 }
  0x9f   :  { %v52_v12 = vmax.f32 %v51_v11, 1e-24 }
  0xa1   :  { %353 = vrsqrt.f32 %v52_v12 }
  0xaa   :  { %v352_v13 = vpop.eup %351 }
  0xab   :  { %v39_v14 = vmul.f32 %v352_v13, %v31_v0 }
  0xad   :  { %40 = vst.msk [vmem:[#allocation2] sm:$0xff] %vm33_vm0, %v39_v14 }
  0xae   :  { %v354_v15 = vpop.eup %353 }
  0xaf   :  { %v54_v17 = vmul.f32 %v354_v15, %v46_v1 }
  0xb4   :  { %v55_v16 = vld [vmem:[#allocation2] sm:$0xff] }
  0xb5   :  { %326 = vmatpush3.xpose.msk.msra.mxu0 %vm33_vm0, %v55_v16 }
  0xb8   :  { %328 = vmatmul.mubr.msk.f32.vlgmr.msra.gmra.mxu0 %vm33_vm0, %v54_v17 }
 0x178   :  { %v128_v24 = vpop.f32.mrf.mxu0 }
 0x179   :  { %v157_v25 = vsel %vm156_vm4, %v128_v24, 0.0  ;;  %v170_v26 = vsel %vm169_vm5, %v128_v24, 0.0  ;;  %v140_v27 = vsel %vm139_vm6, %v128_v24, 0.0 }
 0x17a   :  { %v158_v28 = vsel %vm141_vm7, %v157_v25, 0.0  ;;  %v171_v29 = vsel %vm141_vm7, %v170_v26, 0.0  ;;  %v329_v30 = vpop.f32.mrf.mxu0  ;;  %v142_v31 = vsel %vm141_vm7, %v140_v27, 0.0 }
 0x17b   :  { %v159_v32 = vrot.slane %v158_v28, 4  ;;  %v172_v33 = vrot.slane %v171_v29, 4  ;;  %143 = vadd.xlane.f32.xlu1 %v142_v31 }
 0x17d   :  { %v160_v34 = vadd.f32 %v159_v32, %v158_v28  ;;  %v173_v35 = vadd.f32 %v172_v33, %v171_v29 }
 0x17f   :  { %v161_v36 = vrot.slane %v160_v34, 2  ;;  %v174_v37 = vrot.slane %v173_v35, 2 }
 0x181   :  { %v162_v38 = vadd.f32 %v161_v36, %v160_v34  ;;  %v175_v39 = vadd.f32 %v174_v37, %v173_v35 }
 0x183   :  { %v163_v40 = vrot.slane %v162_v38, 1  ;;  %v176_v41 = vrot.slane %v175_v39, 1 }
 0x185   :  { %v164_v44 = vadd.f32 %v163_v40, %v162_v38  ;;  %v177_v45 = vadd.f32 %v176_v41, %v175_v39 }
 0x187   :  { %v165_v46 = vadd.f32 %v164_v44, %v155_v42  ;;  %v178_v47 = vadd.f32 %v177_v45, %v168_v43 }
 0x189   :  { %167 = vst.msk [vmem:[#allocation3] sm:$0x1] %vm41_vm1, %v165_v46  ;;  %179 = vst.msk [vmem:[#allocation4] sm:$0x1] %vm41_vm1, %v178_v47 }
 0x190   :  { %v184_v48 = vld [vmem:[#allocation3] sm:$0x1]  ;;  %v185_v56 = vld [vmem:[#allocation4] sm:$0x1] }
 0x191   :  { %333 = vmatmul.mubr.msk.f32.vlgmr.msra.gmra.mxu1 %vm141_vm7, %v184_v48 }
 0x204   :  { %v144_v49 = vpop.xlane.xlu1 %143 }
 0x205   :  { %v145_v50 = vrot.slane %v144_v49, 4 }
 0x207   :  { %v146_v51 = vadd.f32 %v145_v50, %v144_v49 }
 0x209   :  { %v147_v52 = vrot.slane %v146_v51, 2 }
 0x20b   :  { %v148_v53 = vadd.f32 %v147_v52, %v146_v51 }
 0x20d   :  { %v149_v54 = vrot.slane %v148_v53, 1 }
 0x20f   :  { %v150_v55 = vadd.f32 %v149_v54, %v148_v53 }
 0x211   :  { %335 = vpush %v150_v55 }
 0x242   :  { %s439_s2 = spop %335 }
 0x243   :  { %v266_v59 = vstv %s439_s2  ;;  %s269_s22 = smul.f32 1.25, %s439_s2 }
 0x251   :  { %v262_v57 = vpop.f32.mrf.mxu1 }
 0x252   :  { %v263_v58 = vadd.f32 %v262_v57, %v185_v56 }
 0x253   :  { %v334_v60 = vpop.f32.mrf.mxu1 }
 0x254   :  { %v267_v61 = vsel %vm192_vm8, %v266_v59, %v263_v58 }
 0x255   :  { %v268_v62 = vmul.f32 1.25, %v267_v61 }
 0x257   :  { %v270_v63 = vsel %vm41_vm1, %v268_v62, -inf }
 0x258   :  { %271 = vmax.xlane.f32.xlu0 %v270_v63 }
 0x2e1   :  { %v272_v0 = vpop.xlane.xlu0 %271 }
 0x2e2   :  { %v273_v1 = vrot.slane %v272_v0, 4 }
 0x2e4   :  { %v274_v2 = vmax.f32 %v272_v0, %v273_v1 }
 0x2e6   :  { %v275_v3 = vrot.slane %v274_v2, 2 }
 0x2e8   :  { %v276_v4 = vmax.f32 %v274_v2, %v275_v3 }
 0x2ea   :  { %v277_v5 = vrot.slane %v276_v4, 1 }
 0x2ec   :  { %v278_v6 = vmax.f32 %v276_v4, %v277_v5 }
 0x2ee   :  { %337 = vpush %v278_v6 }
 0x31f   :  { %s338_s19 = spop %337 }
 0x320   :  { %v280_v7 = vstv %s338_s19 }
 0x321   :  { %v281_v8 = vsub.f32 %v268_v62, %v280_v7 }
 0x323   :  { %v282_v9 = vmul.f32 1.442695, %v281_v8 }
 0x325   :  { %355 = vpow2.f32 %v282_v9 }
 0x332   :  { %v356_v10 = vpop.eup %355 }
 0x333   :  { %v284_v11 = vsel %vm41_vm1, %v356_v10, 0.0 }
 0x334   :  { %285 = vadd.xlane.f32.xlu0 %v284_v11 }
 0x3bd   :  { %v286_v12 = vpop.xlane.xlu0 %285 }
 0x3be   :  { %v287_v13 = vrot.slane %v286_v12, 4 }
 0x3c0   :  { %v288_v14 = vadd.f32 %v287_v13, %v286_v12 }
 0x3c2   :  { %v289_v15 = vrot.slane %v288_v14, 2 }
 0x3c4   :  { %v290_v16 = vadd.f32 %v289_v15, %v288_v14 }
 0x3c6   :  { %v291_v17 = vrot.slane %v290_v16, 1 }
 0x3c8   :  { %v292_v18 = vadd.f32 %v291_v17, %v290_v16 }
 0x3ca   :  { %339 = vpush %v292_v18 }
 0x3fb   :  { %s340_s20 = spop %339 }
 0x3fc   :  { %v294_v19 = vstv %s340_s20 }
 0x3fd   :  { %357 = vlog2.f32 %v294_v19 }
 0x40a   :  { %v358_v20 = vpop.eup %357 }
 0x40b   :  { %v296_v21 = vmul.f32 0.6931472, %v358_v20 }
 0x40d   :  { %341 = vpush %v296_v21 }
 0x43e   :  { %s342_s21 = spop %341 }
 0x43f   :  { %s298_s23 = sadd.f32 %s342_s21, %s338_s19 }
 0x441   :  { %s299_s24 = ssub.f32 %s298_s23, %s269_s22 }
 0x443   :  { %301 = sst [smem:[#allocation9]] %s299_s24 }
 0x444   :  { %309 = dma.smem_to_hbm %s396_s25, 16, %s451_s3, [#allocation8]  }
 0x445   :  { %389 = dma.done.wait [#allocation8], 16  }
 0x446   :  { %390 = vsyncadd [#allocation8], 4294967280 }
 0x447   :  { %313 = sfence }
 0x448   :  { %314 = vsyncpa [#allocation7], 1 }
 0x449   :  { %315 = vsyncpa [#allocation8], 1 }

</bundles_post_ra>
